<compile_context>
chip_gen: v7x
topology: tpu7x:2x2x1
jax: 0.10.0
libtpu: 0.0.40
codegen_flags: <defaults>
</compile_context>

<pallas_src>
import functools

import jax
import jax.numpy as jnp
from jax.experimental import pallas as pl
from jax.experimental.pallas import tpu as pltpu


def _channel_norm_kernel(x_ref, o_ref, *, eps: float, inv_c: float, inv_cm1: float):
    # Block view: (Bt, C, T) — channels on sublanes (axis=1), spatial tile on lanes.
    x = x_ref[...].astype(jnp.float32)
    s = jnp.sum(x, axis=1, keepdims=True)          # (Bt, 1, T)
    sq = jnp.sum(x * x, axis=1, keepdims=True)     # (Bt, 1, T)
    mean = s * inv_c                               # E[x]
    var = (sq - s * mean) * inv_cm1                # unbiased (ddof=1), matches torch.var
    var = jnp.maximum(var, 0.0)                    # guard one-pass cancellation -> NaN
    inv_std = jax.lax.rsqrt(var + eps)
    o_ref[...] = ((x - mean) * inv_std).astype(o_ref.dtype)


def _vmem_capacity_bytes() -> int:
    """Per-TensorCore VMEM capacity; conservative 64 MiB fallback (v7x)."""
    try:
        cap = int(getattr(pltpu.get_tpu_info(), "vmem_capacity_bytes"))
        if cap > 0:
            return cap
    except Exception:
        pass
    return 64 * 1024 * 1024


def _round_up(v: int, m: int) -> int:
    return -(-v // m) * m


def _pick_block(B: int, C: int, hw: int, dtype, vmem_capacity: int,
                max_lanes_override=None):
    """Choose (Bt, tile): lanes per block driven by the VMEM budget, not a fixed cap."""
    in_bytes = jnp.dtype(dtype).itemsize
    sub = 8 if in_bytes >= 4 else (16 if in_bytes == 2 else 32)
    padded_c_in = _round_up(C, sub)                # sublane padding of the in/out blocks
    padded_c_f32 = _round_up(C, 8)                 # sublane padding of f32 temporaries
    # Per lane-column, per batch-row:
    #   2x input double buffer + 2x output double buffer (input dtype)
    # + ~2 block-sized f32 temporaries (x upcast, x*x path) materialized by Mosaic.
    per_lane = 4 * padded_c_in * in_bytes + 2 * padded_c_f32 * 4
    budget = (vmem_capacity * 3) // 8              # ~24 MiB on v7x, ~48 MiB on v5e/v6e
    max_lanes = max(128, budget // per_lane)       # total lanes per block (Bt * tile)
    if max_lanes_override is not None:             # testing hook: force spatial tiling
        max_lanes = max(128, min(max_lanes, int(max_lanes_override)))

    if hw <= max_lanes:
        tile = hw                                  # full-extent last dim (always legal)
        bt = max(1, min(B, max_lanes // max(hw, 1)))  # fold small per-batch slabs
    else:
        tile = max(128, (max_lanes // 128) * 128)  # multiple of 128 -> unmasked stores
        bt = 1
    return bt, tile


def channel_norm(x: jax.Array, eps: float = 1e-4, *, _max_lanes_per_block=None) -> jax.Array:
    """ChannelNorm forward. x: [B, C, H, W] (NCHW), C >= 2."""
    B, C, H, W = x.shape
    if C < 2:
        raise ValueError("ChannelNorm with unbiased variance requires C >= 2")
    hw = H * W
    x2 = x.reshape(B, C, hw)

    vmem_capacity = _vmem_capacity_bytes()
    bt, tile = _pick_block(B, C, hw, x.dtype, vmem_capacity, _max_lanes_per_block)

    kernel = functools.partial(
        _channel_norm_kernel,
        eps=float(eps),
        inv_c=1.0 / float(C),
        inv_cm1=1.0 / float(C - 1),
    )

    out = pl.pallas_call(
        kernel,
        out_shape=jax.ShapeDtypeStruct((B, C, hw), x.dtype),
        grid_spec=pltpu.PrefetchScalarGridSpec(
            num_scalar_prefetch=0,
            grid=(pl.cdiv(B, bt), pl.cdiv(hw, tile)),
            in_specs=[
                pl.BlockSpec((bt, C, tile), lambda b, s: (b, 0, s)),
            ],
            out_specs=pl.BlockSpec((bt, C, tile), lambda b, s: (b, 0, s)),
        ),
        compiler_params=pltpu.CompilerParams(
            dimension_semantics=("parallel", "parallel"),
            # ~48 MiB on v7x (64 MiB VMEM/TC), ~96 MiB on v5e/v6e (128 MiB VMEM);
            # always explicit so v5e's 16 MiB default scoped limit never bites.
            vmem_limit_bytes=(vmem_capacity * 3) // 4,
        ),
    )(x2)

    return out.reshape(B, C, H, W)


def _reference(x, eps):
    mean = jnp.mean(x, axis=1, keepdims=True)
    var = jnp.var(x, axis=1, keepdims=True, ddof=1)
    return (x - mean) / jnp.sqrt(var + eps)


if __name__ == "__main__":
    key = jax.random.PRNGKey(0)

    # Primary small test (shapes implied by the module usage): B=2, C=4, 16x16.
    # Per-batch slab is tiny, so both batches fold into one block (Bt=2, grid=(1,1)).
    B, C, H, W = 2, 4, 16, 16
    x = jax.random.normal(key, (B, C, H, W), dtype=jnp.float32)
    y = jax.block_until_ready(channel_norm(x, eps=1e-4))
    y_ref = _reference(x, 1e-4)
    assert y.shape == x.shape and y.dtype == x.dtype
    assert jnp.max(jnp.abs(y - y_ref)) < 1e-4

    # Odd batch + hw not a multiple of 128: exercises the padded/masked partial
    # batch block (B=3 with Bt=2) and a full-extent (non-128-multiple) lane dim.
    key2 = jax.random.PRNGKey(1)
    x2 = jax.random.normal(key2, (3, 4, 72, 72), dtype=jnp.float32)
    y2 = jax.block_until_ready(channel_norm(x2, eps=1e-4))
    assert jnp.max(jnp.abs(y2 - _reference(x2, 1e-4))) < 1e-4

    # Force the spatial-tiling path (tile < hw, partial last spatial block) via the
    # testing hook, independent of which TPU generation we run on.
    key3 = jax.random.PRNGKey(2)
    x3 = jax.random.normal(key3, (2, 4, 40, 40), dtype=jnp.float32)   # hw = 1600
    y3 = jax.block_until_ready(channel_norm(x3, eps=1e-4, _max_lanes_per_block=512))
    assert jnp.max(jnp.abs(y3 - _reference(x3, 1e-4))) < 1e-4

    print("KERNEL_OK")
</pallas_src>

<mosaic_0001>
module attributes {stable_mosaic.version = 11 : i64} {
  func.func @_channel_norm_kernel(%arg0: i32, %arg1: i32, %arg2: memref<2x4x256xf32, #tpu.memory_space<vmem>>, %arg3: memref<2x4x256xf32, #tpu.memory_space<vmem>>) attributes {dimension_semantics = [#tpu.dimension_semantics<parallel>, #tpu.dimension_semantics<parallel>], iteration_bounds = array<i64: 1, 1>, scalar_prefetch = 0 : i64, scratch_operands = 0 : i64, tpu.core_type = #tpu.core_type<tc>, window_params = [{transform_indices = @transform_0, window_bounds = array<i64: 2, 4, 256>}, {transform_indices = @transform_1, window_bounds = array<i64: 2, 4, 256>}]} {
    %c0 = arith.constant 0 : index
    %c0_0 = arith.constant 0 : index
    %c0_1 = arith.constant 0 : index
    %0 = vector.load %arg2[%c0, %c0_0, %c0_1] : memref<2x4x256xf32, #tpu.memory_space<vmem>>, vector<2x4x256xf32>
    %cst = arith.constant dense<0.000000e+00> : vector<2x256xf32>
    %1 = vector.multi_reduction <add>, %0, %cst [1] : vector<2x4x256xf32> to vector<2x256xf32>
    %2 = vector.shape_cast %1 : vector<2x256xf32> to vector<2x1x256xf32>
    %3 = arith.mulf %0, %0 : vector<2x4x256xf32>
    %cst_2 = arith.constant dense<0.000000e+00> : vector<2x256xf32>
    %4 = vector.multi_reduction <add>, %3, %cst_2 [1] : vector<2x4x256xf32> to vector<2x256xf32>
    %5 = vector.shape_cast %4 : vector<2x256xf32> to vector<2x1x256xf32>
    %cst_3 = arith.constant 2.500000e-01 : f32
    %6 = vector.broadcast %cst_3 : f32 to vector<2x1x256xf32>
    %7 = arith.mulf %2, %6 : vector<2x1x256xf32>
    %8 = arith.mulf %2, %7 : vector<2x1x256xf32>
    %9 = arith.subf %5, %8 : vector<2x1x256xf32>
    %cst_4 = arith.constant 0.333333343 : f32
    %10 = vector.broadcast %cst_4 : f32 to vector<2x1x256xf32>
    %11 = arith.mulf %9, %10 : vector<2x1x256xf32>
    %cst_5 = arith.constant 0.000000e+00 : f32
    %12 = vector.broadcast %cst_5 : f32 to vector<2x1x256xf32>
    %13 = arith.maximumf %11, %12 : vector<2x1x256xf32>
    %cst_6 = arith.constant 9.99999974E-5 : f32
    %14 = vector.broadcast %cst_6 : f32 to vector<2x1x256xf32>
    %15 = arith.addf %13, %14 : vector<2x1x256xf32>
    %16 = math.rsqrt %15 : vector<2x1x256xf32>
    %17 = vector.broadcast %7 : vector<2x1x256xf32> to vector<2x4x256xf32>
    %18 = arith.subf %0, %17 : vector<2x4x256xf32>
    %19 = vector.broadcast %16 : vector<2x1x256xf32> to vector<2x4x256xf32>
    %20 = arith.mulf %18, %19 : vector<2x4x256xf32>
    %c0_7 = arith.constant 0 : index
    %c0_8 = arith.constant 0 : index
    %c0_9 = arith.constant 0 : index
    %21 = vector.load %arg3[%c0_7, %c0_8, %c0_9] : memref<2x4x256xf32, #tpu.memory_space<vmem>>, vector<2x4x256xf32>
    tpu.vector_store %arg3[%c0_7, %c0_8, %c0_9], %20 {strides = array<i32>} : memref<2x4x256xf32, #tpu.memory_space<vmem>>, vector<2x4x256xf32>,
    return
  }
  func.func @transform_0(%arg0: i32, %arg1: i32) -> (i32, i32, i32) {
    %c0_i32 = arith.constant 0 : i32
    %c0_i32_0 = arith.constant 0 : i32
    return %arg0, %c0_i32, %arg1 : i32, i32, i32
  }
  func.func @transform_1(%arg0: i32, %arg1: i32) -> (i32, i32, i32) {
    %c0_i32 = arith.constant 0 : i32
    %c0_i32_0 = arith.constant 0 : i32
    return %arg0, %c0_i32, %arg1 : i32, i32, i32
  }
}

</mosaic_0001>

<bundles_post_ra>
// kernel: tpu_custom_call.1
= control target key start
LH: loop header
LB: loop body
LE: loop exit
PB: predicated region body
PF: predicated region fallthrough
CT: control target
= control target key end

     0   :  { %6 = vsyncpa [#allocation3], 0  ;;  %s293_s0 = inlined_call_operand.hbm [shape: f32[2,4,256], index: 0, kind: input, shape index: {}]   ;;  %s294_s1 = inlined_call_operand.hbm [shape: f32[2,4,256], index: 1, kind: output, shape index: {}]  }
   0x1   :  { %7 = vsyncpa [#allocation4], 0  ;;  %s225_s6 = smov [#allocation2]   ;;  %s177_s10 = scalar_lea.hbm %s293_s0, 256 }
   0x2   :  { %s13_s7 = sshll.u32 %s225_s6, 4  ;;  %p178_p0 = scmp.ne.s32.totalorder %s293_s0, %s177_s10  ;;  %s14_s7 = int_to_ptr.vmem [resolvable:$true] %s13_s7 }
   0x3   :  { %p181_p1 = scmp.lt.u32.totalorder %s177_s10, %s293_s0 }
   0x5   :  { %p183_p2 = pnand %p181_p1, %p178_p0 }
   0x7   :  { %186 = shalt.err (!%p183_p2)
}
   0x8   :  { %s187_s15 = scalar_lea.vmem %s14_s7, 256  ;;  %p192_p4 = scmp.lt.s32.totalorder %s14_s7, %s14_s7 }
   0x9   :  { %p188_p3 = scmp.ne.s32.totalorder %s14_s7, %s187_s15  ;;  %p193_p5 = scmp.lt.s32.totalorder %s187_s15, %s187_s15 }
   0xb   :  { %p194_p6 = por %p193_p5, %p192_p4 }
   0xd   :  { %p195_p7 = pnand %p194_p6, %p188_p3 }
   0xf   :  { %198 = shalt.err (!%p195_p7)
}
  0x10   :  { %s226_s16 = smov 128   ;;  %s227_s17 = smov 8  }
  0x11   :  { %19 = dma.hbm_to_vmem [thread:$0]  %s293_s0, 256, %s14_s7, [#allocation3], %s226_s16, %s226_s16, %s227_s17  }
  0x12   :  { %221 = dma.done.wait [#allocation3], 256  }
  0x13   :  { %222 = vsyncadd [#allocation3], 4294967040  ;;  %vm31_vm0 = vcmask 1043456   ;;  %v254_v0 = vld [vmem:[#allocation2] sm:$0xff]  ;;  %v256_v1 = vld [vmem:[#allocation2 + $0x8] sm:$0xff]  ;;  %s228_s0 = smov [#allocation5]  }
  0x14   :  { %v27_v2 = vcombine.high %v254_v0, %v254_v0  ;;  %v32_v3 = vsel %vm31_vm0, %v254_v0, 0.0  ;;  %v60_v4 = vmul.f32 %v254_v0, %v254_v0  ;;  %v28_v5 = vcombine.high %v256_v1, %v256_v1  ;;  %s151_s20 = sshll.u32 %s228_s0, 4  ;;  %s152_s20 = int_to_ptr.vmem [resolvable:$true] %s151_s20 }
  0x15   :  { %v33_v6 = vrot.slane %v32_v3, 4  ;;  %v46_v7 = vsel %vm31_vm0, %v256_v1, 0.0  ;;  %v61_v8 = vmul.f32 %v256_v1, %v256_v1  ;;  %s199_s21 = scalar_lea.vmem %s152_s20, 256  ;;  %p204_p9 = scmp.lt.s32.totalorder %s152_s20, %s152_s20 }
  0x16   :  { %v39_v9 = vsel %vm31_vm0, %v27_v2, 0.0  ;;  %v64_v10 = vcombine.high %v60_v4, %v60_v4  ;;  %v68_v11 = vsel %vm31_vm0, %v60_v4, 0.0  ;;  %v47_v12 = vrot.slane %v46_v7, 4  ;;  %p200_p8 = scmp.ne.s32.totalorder %s152_s20, %s199_s21  ;;  %p205_p10 = scmp.lt.s32.totalorder %s199_s21, %s199_s21 }
  0x17   :  { %v34_v13 = vadd.f32 %v33_v6, %v32_v3  ;;  %v40_v14 = vrot.slane %v39_v9, 4  ;;  %v69_v15 = vrot.slane %v68_v11, 4  ;;  %v53_v16 = vsel %vm31_vm0, %v28_v5, 0.0 }
  0x18   :  { %v75_v17 = vsel %vm31_vm0, %v64_v10, 0.0  ;;  %v48_v18 = vadd.f32 %v47_v12, %v46_v7  ;;  %v54_v19 = vrot.slane %v53_v16, 4  ;;  %v65_v20 = vcombine.high %v61_v8, %v61_v8  ;;  %p206_p11 = por %p205_p10, %p204_p9 }
  0x19   :  { %v35_v21 = vrot.slane %v34_v13, 2  ;;  %v41_v22 = vadd.f32 %v40_v14, %v39_v9  ;;  %v70_v23 = vadd.f32 %v69_v15, %v68_v11  ;;  %v76_v24 = vrot.slane %v75_v17, 4 }
  0x1a   :  { %v49_v25 = vrot.slane %v48_v18, 2  ;;  %v55_v26 = vadd.f32 %v54_v19, %v53_v16  ;;  %v82_v27 = vsel %vm31_vm0, %v61_v8, 0.0  ;;  %v89_v28 = vsel %vm31_vm0, %v65_v20, 0.0  ;;  %p207_p12 = pnand %p206_p11, %p200_p8 }
  0x1b   :  { %v36_v29 = vadd.f32 %v35_v21, %v34_v13  ;;  %v42_v30 = vrot.slane %v41_v22, 2  ;;  %v71_v31 = vrot.slane %v70_v23, 2  ;;  %v77_v32 = vadd.f32 %v76_v24, %v75_v17 }
  0x1c   :  { %v50_v33 = vadd.f32 %v49_v25, %v48_v18  ;;  %v56_v34 = vrot.slane %v55_v26, 2  ;;  %v83_v35 = vrot.slane %v82_v27, 4  ;;  %v90_v36 = vrot.slane %v89_v28, 4 }
  0x1d   :  { %v37_v37 = vrot.slane %v36_v29, 1  ;;  %v43_v38 = vadd.f32 %v42_v30, %v41_v22  ;;  %v72_v39 = vadd.f32 %v71_v31, %v70_v23  ;;  %v78_v40 = vrot.slane %v77_v32, 2 }
  0x1e   :  { %v51_v41 = vrot.slane %v50_v33, 1  ;;  %v57_v42 = vadd.f32 %v56_v34, %v55_v26  ;;  %v84_v43 = vadd.f32 %v83_v35, %v82_v27  ;;  %v91_v44 = vadd.f32 %v90_v36, %v89_v28 }
  0x1f   :  { %v38_v45 = vadd.f32 %v37_v37, %v36_v29  ;;  %v44_v46 = vrot.slane %v43_v38, 1  ;;  %v73_v47 = vrot.slane %v72_v39, 1  ;;  %v79_v48 = vadd.f32 %v78_v40, %v77_v32 }
  0x20   :  { %v52_v49 = vadd.f32 %v51_v41, %v50_v33  ;;  %v58_v50 = vrot.slane %v57_v42, 1  ;;  %v85_v51 = vrot.slane %v84_v43, 2  ;;  %v92_v52 = vrot.slane %v91_v44, 2 }
  0x21   :  { %v45_v53 = vadd.f32 %v44_v46, %v43_v38  ;;  %v74_v54 = vadd.f32 %v73_v47, %v72_v39  ;;  %v80_v55 = vrot.slane %v79_v48, 1  ;;  %v96_v56 = vmul.f32 0.25, %v38_v45 }
  0x22   :  { %v59_v57 = vadd.f32 %v58_v50, %v57_v42  ;;  %v86_v58 = vadd.f32 %v85_v51, %v84_v43  ;;  %v93_v59 = vadd.f32 %v92_v52, %v91_v44  ;;  %v98_v60 = vmul.f32 0.25, %v52_v49 }
  0x23   :  { %v81_v61 = vadd.f32 %v80_v55, %v79_v48  ;;  %v97_v62 = vmul.f32 0.25, %v45_v53  ;;  %v100_v63 = vmul.f32 %v96_v56, %v38_v45 }
  0x24   :  { %v87_v2 = vrot.slane %v86_v58, 1  ;;  %v94_v3 = vrot.slane %v93_v59, 1  ;;  %v99_v4 = vmul.f32 0.25, %v59_v57  ;;  %v102_v5 = vmul.f32 %v98_v60, %v52_v49 }
  0x25   :  { %v101_v6 = vmul.f32 %v97_v62, %v45_v53  ;;  %v104_v7 = vsub.f32 %v74_v54, %v100_v63  ;;  %v128_v26 = vcombine.low %v96_v56, %v97_v62 }
  0x26   :  { %v88_v8 = vadd.f32 %v87_v2, %v86_v58  ;;  %v95_v9 = vadd.f32 %v94_v3, %v93_v59  ;;  %v103_v10 = vmul.f32 %v99_v4, %v59_v57  ;;  %v129_v27 = vcombine.low %v98_v60, %v99_v4 }
  0x27   :  { %v105_v11 = vsub.f32 %v81_v61, %v101_v6  ;;  %v108_v12 = vmul.f32 0.33333334, %v104_v7  ;;  %v132_v29 = vsub.f32 %v254_v0, %v128_v26 }
  0x28   :  { %v106_v13 = vsub.f32 %v88_v8, %v102_v5  ;;  %v107_v14 = vsub.f32 %v95_v9, %v103_v10  ;;  %v133_v33 = vsub.f32 %v256_v1, %v129_v27 }
  0x29   :  { %v109_v15 = vmul.f32 0.33333334, %v105_v11  ;;  %v112_v16 = vmax.f32 %v108_v12, 0.0 }
  0x2a   :  { %v110_v17 = vmul.f32 0.33333334, %v106_v13  ;;  %v111_v18 = vmul.f32 0.33333334, %v107_v14 }
  0x2b   :  { %v113_v19 = vmax.f32 %v109_v15, 0.0  ;;  %v116_v20 = vadd.f32 0.0001, %v112_v16 }
  0x2c   :  { %v114_v21 = vmax.f32 %v110_v17, 0.0  ;;  %v115_v22 = vmax.f32 %v111_v18, 0.0 }
  0x2d   :  { %v117_v23 = vadd.f32 0.0001, %v113_v19  ;;  %169 = vrsqrt.f32 %v116_v20 }
  0x2e   :  { %v118_v24 = vadd.f32 0.0001, %v114_v21  ;;  %v119_v25 = vadd.f32 0.0001, %v115_v22 }
  0x2f   :  { %171 = vrsqrt.f32 %v117_v23 }
  0x30   :  { %173 = vrsqrt.f32 %v118_v24 }
  0x31   :  { %175 = vrsqrt.f32 %v119_v25 }
  0x37   :  { %v170_v28 = vpop.eup %169 }
  0x39   :  { %v172_v30 = vpop.eup %171 }
  0x3a   :  { %v174_v31 = vpop.eup %173  ;;  %v138_v32 = vcombine.low %v170_v28, %v172_v30 }
  0x3b   :  { %v176_v34 = vpop.eup %175 }
  0x3c   :  { %v142_v35 = vmul.f32 %v138_v32, %v132_v29  ;;  %v139_v36 = vcombine.low %v174_v31, %v176_v34 }
  0x3e   :  { %144 = vst [vmem:[#allocation5] sm:$0xff] %v142_v35  ;;  %v143_v37 = vmul.f32 %v139_v36, %v133_v33 }
  0x40   :  { %145 = vst [vmem:[#allocation5 + $0x8] sm:$0xff] %v143_v37 }
  0x41   :  { %210 = shalt.err (!%p207_p12)
}
  0x42   :  { %s211_s24 = scalar_lea.hbm %s294_s1, 256 }
  0x43   :  { %p212_p13 = scmp.ne.s32.totalorder %s294_s1, %s211_s24  ;;  %p215_p0 = scmp.lt.u32.totalorder %s211_s24, %s294_s1 }
  0x45   :  { %p217_p1 = pnand %p215_p0, %p212_p13 }
  0x47   :  { %220 = shalt.err (!%p217_p1)
}
  0x48   :  { %157 = dma.vmem_to_hbm [thread:$0]  %s152_s20, 256, %s294_s1, [#allocation4], %s226_s16, %s226_s16, %s227_s17  }
  0x49   :  { %223 = dma.done.wait [#allocation4], 256  }
  0x4a   :  { %224 = vsyncadd [#allocation4], 4294967040 }
  0x4b   :  { %161 = vsyncpa [#allocation3], 1 }
  0x4c   :  { %162 = vsyncpa [#allocation4], 1 }

</bundles_post_ra>
